<compile_context>
chip_gen: v7x
topology: tpu7x:2x2x1
jax: 0.10.0
libtpu: 0.0.40
codegen_flags: <defaults>
</compile_context>

<pallas_src>
import functools

import jax
import jax.numpy as jnp
from jax.experimental import pallas as pl
from jax.experimental.pallas import tpu as pltpu


# Largest f32-equivalent channel-slab (N * tc * L * 4 bytes) handled by the
# fused single-read path.  Conservative: with double-buffered in/out blocks
# plus working temps the footprint stays well under v7x's 64 MiB VMEM.
_FUSED_SLAB_BYTES = 6 << 20


# --------------------------------------------------------------------------
# Tiling helpers
# --------------------------------------------------------------------------
def _pick_channel_tile(C, itemsize):
    """Sublane (channel) tile: dtype-aware packing, or full C if it won't divide."""
    sub = max(8, 32 // max(1, itemsize))      # 8 f32 / 16 bf16 / 32 int8
    if C % sub == 0:
        return sub
    if C % 8 == 0:
        return 8
    return C                                  # full-extent block (small/odd C)


def _pick_tiles(C, L, itemsize, max_block_bytes):
    """Choose (channel_tile, lane_tile) for blocks over a (N, C, L) slab.

    Lane tiles are multiples of 128 (lane-dense stores); when no 128-multiple
    divides L we use a cdiv grid and mask the tail in the stats kernel.
    Block budget defaults to ~4 MiB so per-grid-step overhead (~0.35 us) is
    amortized, which matters most on v7x's ~3.2 TB/s HBM.
    """
    tc = _pick_channel_tile(C, itemsize)

    if L <= 128:
        tl = L                                # full-extent lane block
    else:
        max_tl = max(128, (max_block_bytes // (tc * itemsize)) // 128 * 128)
        l_pad = ((L + 127) // 128) * 128
        tl = min(l_pad, max_tl)
        # Prefer an exact 128-multiple divisor of L (no masked tail) if one
        # exists that is not much smaller than the budget-limited tile.
        best_div = 0
        d = tl - (tl % 128)
        while d >= 128:
            if L % d == 0:
                best_div = d
                break
            d -= 128
        if best_div >= max(128, tl // 2):
            tl = best_div

    # If a single lane tile already covers L, spend leftover budget on more
    # channels per block (fewer grid steps).
    if tl >= L:
        while C % (tc * 2) == 0 and (tc * 2) * tl * itemsize <= max_block_bytes:
            tc *= 2
    return tc, tl


def _leading_semantics(axis_size):
    """CORE_PARALLEL on the leading grid axis for multi-TensorCore chips (v7x).

    Plain "parallel" does not change codegen on single-TC chips, and on v7x it
    does not shard the two TensorCores; only CORE_PARALLEL does.  Gated by
    device kind so v5e/v6e keep the well-tested plain-parallel path.
    """
    core_par = getattr(pltpu, "CORE_PARALLEL", None)
    if core_par is None or axis_size < 2 or axis_size % 2 != 0:
        return pltpu.PARALLEL
    try:
        kind = jax.devices()[0].device_kind.lower()
    except Exception:
        return pltpu.PARALLEL
    if ("v7" in kind) or ("tpu7" in kind):
        return core_par
    return pltpu.PARALLEL


# --------------------------------------------------------------------------
# Kernels
# --------------------------------------------------------------------------
def _stats_kernel(x_ref, sum_ref, sq_ref, *, tl, L, needs_mask):
    # x_ref: (tc, tl); sum_ref / sq_ref: (tc, 1) accumulators resident across
    # the innermost (reduction) grid axis.
    @pl.when(pl.program_id(2) == 0)
    def _():
        sum_ref[...] = jnp.zeros_like(sum_ref)
        sq_ref[...] = jnp.zeros_like(sq_ref)

    x = x_ref[...].astype(jnp.float32)
    if needs_mask:
        # cdiv grid: the boundary tile's out-of-bounds lanes hold garbage;
        # zero them before accumulating (valid lanes: lane + l*tl < L).
        l = pl.program_id(2)
        lane = jax.lax.broadcasted_iota(jnp.int32, x.shape, x.ndim - 1)
        x = jnp.where(lane < (L - l * tl), x, 0.0)

    sum_ref[...] += jnp.sum(x, axis=-1, keepdims=True)
    sq_ref[...] += jnp.sum(x * x, axis=-1, keepdims=True)


def _norm_kernel(x_ref, scale_ref, shift_ref, o_ref):
    # Folded affine: y = x * (gamma*inv_std) + (beta - mean*gamma*inv_std).
    # Boundary-tile OOB lanes compute garbage but are dropped on writeback.
    # TODO(synk): for bf16 inputs on v6e/v7x the multiply-add could stay bf16.
    x = x_ref[...].astype(jnp.float32)
    o_ref[...] = (x * scale_ref[...] + shift_ref[...]).astype(o_ref.dtype)


def _fused_kernel(x_ref, g_ref, b_ref, o_ref, *, eps, count):
    # x_ref/o_ref: (N, tc, L) -- one full channel slab resident in VMEM.
    # Single HBM read: stats and normalization from the same slab.
    xf = x_ref[...].astype(jnp.float32)
    s = jnp.sum(jnp.sum(xf, axis=2, keepdims=True), axis=0, keepdims=True)
    sq = jnp.sum(jnp.sum(xf * xf, axis=2, keepdims=True), axis=0, keepdims=True)
    mean = s / count                                      # (1, tc, 1)
    # TODO(synk): E[x^2]-E[x]^2 can cancel for |mean| >> std; a shifted /
    # Welford-style accumulation would be more robust for such data.
    var = jnp.maximum(sq / count - mean * mean, 0.0)
    inv_std = jax.lax.rsqrt(var + eps)
    g = g_ref[...].astype(jnp.float32).reshape(1, g_ref.shape[0], 1)
    b = b_ref[...].astype(jnp.float32).reshape(1, b_ref.shape[0], 1)
    scale = g * inv_std
    shift = b - mean * scale
    o_ref[...] = (x_ref[...].astype(jnp.float32) * scale + shift).astype(o_ref.dtype)


# --------------------------------------------------------------------------
# Wrappers
# --------------------------------------------------------------------------
def _fused_bn(x3, g2, b2, eps, tc, itemsize):
    N, C, L = x3.shape
    grid = (C // tc,)
    slab_in = N * tc * L * itemsize
    slab_f32 = N * tc * L * 4
    vmem_limit = int(min(max(32 << 20, 4 * slab_in + 2 * slab_f32 + (4 << 20)),
                         48 << 20))
    total = N * C * L
    kernel = functools.partial(_fused_kernel, eps=float(eps), count=float(N * L))

    return pl.pallas_call(
        kernel,
        out_shape=jax.ShapeDtypeStruct((N, C, L), x3.dtype),
        grid_spec=pltpu.PrefetchScalarGridSpec(
            num_scalar_prefetch=0,
            grid=grid,
            in_specs=[pl.BlockSpec((N, tc, L), lambda c: (0, c, 0)),
                      pl.BlockSpec((tc, 1), lambda c: (c, 0)),
                      pl.BlockSpec((tc, 1), lambda c: (c, 0))],
            out_specs=pl.BlockSpec((N, tc, L), lambda c: (0, c, 0)),
        ),
        compiler_params=pltpu.CompilerParams(
            dimension_semantics=(_leading_semantics(grid[0]),),
            vmem_limit_bytes=vmem_limit,
        ),
        cost_estimate=pl.CostEstimate(
            flops=5 * total, transcendentals=0,
            bytes_accessed=2 * total * itemsize),
    )(x3, g2, b2)


def _two_pass_bn(x3, g2, b2, eps, itemsize, max_block_bytes):
    N, C, L = x3.shape
    tc, tl = _pick_tiles(C, L, itemsize, max_block_bytes)
    needs_mask = (L % tl) != 0
    grid = (N, C // tc, pl.cdiv(L, tl))

    block_bytes = tc * tl * itemsize
    vmem_limit = int(min(max(32 << 20, 6 * block_bytes), 48 << 20))
    total = N * C * L

    # ---- pass 1: per-(n, channel-block) partial sums / sums of squares ----
    stats = functools.partial(_stats_kernel, tl=tl, L=L, needs_mask=needs_mask)
    psum, psq = pl.pallas_call(
        stats,
        out_shape=(jax.ShapeDtypeStruct((N, C, 1), jnp.float32),
                   jax.ShapeDtypeStruct((N, C, 1), jnp.float32)),
        grid_spec=pltpu.PrefetchScalarGridSpec(
            num_scalar_prefetch=0,
            grid=grid,
            in_specs=[pl.BlockSpec((None, tc, tl), lambda n, c, l: (n, c, l))],
            out_specs=[pl.BlockSpec((None, tc, 1), lambda n, c, l: (n, c, 0)),
                       pl.BlockSpec((None, tc, 1), lambda n, c, l: (n, c, 0))],
        ),
        compiler_params=pltpu.CompilerParams(
            dimension_semantics=(_leading_semantics(N), pltpu.PARALLEL,
                                 pltpu.ARBITRARY),
            vmem_limit_bytes=vmem_limit,
        ),
        cost_estimate=pl.CostEstimate(
            flops=3 * total, transcendentals=0,
            bytes_accessed=total * itemsize),
    )(x3)

    # ---- tiny per-channel math, kept in float32 throughout ----
    count = float(N * L)
    s = jnp.sum(psum, axis=0)                          # (C, 1)
    sq = jnp.sum(psq, axis=0)                          # (C, 1)
    mean = s / count
    # TODO(synk): E[x^2]-E[x]^2 cancels for |mean| >> std; consider a shifted
    # (Welford-style) accumulation if such inputs matter.
    var = jnp.maximum(sq / count - mean * mean, 0.0)
    inv_std = jax.lax.rsqrt(var + eps)
    scale = g2 * inv_std                               # (C, 1) f32
    shift = b2 - mean * scale                          # (C, 1) f32

    # ---- pass 2: normalize, streamed NCHW-native ----
    return pl.pallas_call(
        _norm_kernel,
        out_shape=jax.ShapeDtypeStruct((N, C, L), x3.dtype),
        grid_spec=pltpu.PrefetchScalarGridSpec(
            num_scalar_prefetch=0,
            grid=grid,
            in_specs=[pl.BlockSpec((None, tc, tl), lambda n, c, l: (n, c, l)),
                      pl.BlockSpec((tc, 1), lambda n, c, l: (c, 0)),
                      pl.BlockSpec((tc, 1), lambda n, c, l: (c, 0))],
            out_specs=pl.BlockSpec((None, tc, tl), lambda n, c, l: (n, c, l)),
        ),
        compiler_params=pltpu.CompilerParams(
            dimension_semantics=(_leading_semantics(N), pltpu.PARALLEL,
                                 pltpu.PARALLEL),
            vmem_limit_bytes=vmem_limit,
        ),
        cost_estimate=pl.CostEstimate(
            flops=2 * total, transcendentals=0,
            bytes_accessed=2 * total * itemsize),
    )(x3, scale, shift)


def batch_norm_2d(x, gamma, beta, eps=1e-5, *, force_two_pass=False,
                  max_block_bytes=4 << 20):
    """BatchNorm2d forward using current-batch statistics (training mode).

    x: (N, C, H, W); gamma, beta: (C,). Returns same shape/dtype as x.
    TODO(synk): running_mean / running_var buffer updates (a training-mode
    side effect of nn.BatchNorm2d) are not produced; they do not affect the
    forward output.
    """
    N, C, H, W = x.shape
    L = H * W
    itemsize = jnp.dtype(x.dtype).itemsize
    x3 = x.reshape(N, C, L)                    # contiguous, no data movement
    g2 = gamma.astype(jnp.float32).reshape(C, 1)
    b2 = beta.astype(jnp.float32).reshape(C, 1)

    tc_fused = _pick_channel_tile(C, itemsize)
    slab_f32 = N * tc_fused * L * 4
    if (not force_two_pass) and slab_f32 <= _FUSED_SLAB_BYTES:
        y3 = _fused_bn(x3, g2, b2, eps, tc_fused, itemsize)
    else:
        y3 = _two_pass_bn(x3, g2, b2, eps, itemsize, max_block_bytes)
    return y3.reshape(N, C, H, W)


def reference_bn(x, gamma, beta, eps=1e-5):
    xf = x.astype(jnp.float32)
    mean = jnp.mean(xf, axis=(0, 2, 3), keepdims=True)
    var = jnp.mean((xf - mean) ** 2, axis=(0, 2, 3), keepdims=True)
    g = gamma.reshape(1, -1, 1, 1).astype(jnp.float32)
    b = beta.reshape(1, -1, 1, 1).astype(jnp.float32)
    return ((xf - mean) * jax.lax.rsqrt(var + eps) * g + b).astype(x.dtype)


if __name__ == "__main__":
    key = jax.random.PRNGKey(0)

    # Primary check: module-consistent small shape (fused single-read path).
    N, C, H, W = 2, 4, 16, 16
    x = jax.random.normal(key, (N, C, H, W), dtype=jnp.float32)
    gamma = jnp.ones((C,), dtype=jnp.float32)   # nn.BatchNorm2d default init
    beta = jnp.zeros((C,), dtype=jnp.float32)

    out = jax.block_until_ready(batch_norm_2d(x, gamma, beta))
    ref = reference_bn(x, gamma, beta)
    assert out.shape == x.shape and out.dtype == x.dtype
    assert jnp.allclose(out, ref, atol=1e-4, rtol=1e-4), "fused path mismatch"

    # Two-pass path with L a multiple of 128 (single lane tile, tc growth).
    out_tp = jax.block_until_ready(
        batch_norm_2d(x, gamma, beta, force_two_pass=True))
    assert jnp.allclose(out_tp, ref, atol=1e-4, rtol=1e-4), "two-pass mismatch"

    # Two-pass path, non-128-multiple spatial size with a tiny block budget:
    # exercises the iota-masked tail tile and multi-tile accumulation.
    k1, k2, k3, k4 = jax.random.split(key, 4)
    x2 = jax.random.normal(k1, (2, 8, 14, 14), dtype=jnp.float32)   # L = 196
    g2 = 1.0 + 0.1 * jax.random.normal(k2, (8,), dtype=jnp.float32)
    b2 = 0.1 * jax.random.normal(k3, (8,), dtype=jnp.float32)
    out2 = jax.block_until_ready(
        batch_norm_2d(x2, g2, b2, force_two_pass=True, max_block_bytes=4096))
    ref2 = reference_bn(x2, g2, b2)
    assert jnp.allclose(out2, ref2, atol=1e-4, rtol=1e-4), "masked-tail mismatch"

    # Fused path with more than one channel block.
    x4 = jax.random.normal(k4, (2, 16, 8, 8), dtype=jnp.float32)
    g4 = 1.0 + 0.1 * jax.random.normal(k2, (16,), dtype=jnp.float32)
    b4 = 0.1 * jax.random.normal(k3, (16,), dtype=jnp.float32)
    out4 = jax.block_until_ready(batch_norm_2d(x4, g4, b4))
    ref4 = reference_bn(x4, g4, b4)
    assert jnp.allclose(out4, ref4, atol=1e-4, rtol=1e-4), "multi-block fused mismatch"

    print("KERNEL_OK")
</pallas_src>

<mosaic_0001>
module attributes {stable_mosaic.version = 11 : i64} {
  func.func @_fused_kernel(%arg0: i32, %arg1: memref<2x4x256xf32, #tpu.memory_space<vmem>>, %arg2: memref<4x1xf32, #tpu.memory_space<vmem>>, %arg3: memref<4x1xf32, #tpu.memory_space<vmem>>, %arg4: memref<2x4x256xf32, #tpu.memory_space<vmem>>) attributes {dimension_semantics = [#tpu.dimension_semantics<parallel>], iteration_bounds = array<i64: 1>, scalar_prefetch = 0 : i64, scratch_operands = 0 : i64, tpu.core_type = #tpu.core_type<tc>, window_params = [{transform_indices = @transform_0, window_bounds = array<i64: 2, 4, 256>}, {transform_indices = @transform_1, window_bounds = array<i64: 4, 1>}, {transform_indices = @transform_2, window_bounds = array<i64: 4, 1>}, {transform_indices = @transform_3, window_bounds = array<i64: 2, 4, 256>}]} {
    %c0 = arith.constant 0 : index
    %c0_0 = arith.constant 0 : index
    %c0_1 = arith.constant 0 : index
    %0 = vector.load %arg1[%c0, %c0_0, %c0_1] : memref<2x4x256xf32, #tpu.memory_space<vmem>>, vector<2x4x256xf32>
    %cst = arith.constant dense<0.000000e+00> : vector<2x4xf32>
    %1 = vector.multi_reduction <add>, %0, %cst [2] : vector<2x4x256xf32> to vector<2x4xf32>
    %2 = vector.shape_cast %1 : vector<2x4xf32> to vector<2x4x1xf32>
    %cst_2 = arith.constant dense<0.000000e+00> : vector<4x1xf32>
    %3 = vector.multi_reduction <add>, %2, %cst_2 [0] : vector<2x4x1xf32> to vector<4x1xf32>
    %4 = vector.shape_cast %3 : vector<4x1xf32> to vector<1x4x1xf32>
    %5 = arith.mulf %0, %0 : vector<2x4x256xf32>
    %cst_3 = arith.constant dense<0.000000e+00> : vector<2x4xf32>
    %6 = vector.multi_reduction <add>, %5, %cst_3 [2] : vector<2x4x256xf32> to vector<2x4xf32>
    %7 = vector.shape_cast %6 : vector<2x4xf32> to vector<2x4x1xf32>
    %cst_4 = arith.constant dense<0.000000e+00> : vector<4x1xf32>
    %8 = vector.multi_reduction <add>, %7, %cst_4 [0] : vector<2x4x1xf32> to vector<4x1xf32>
    %9 = vector.shape_cast %8 : vector<4x1xf32> to vector<1x4x1xf32>
    %cst_5 = arith.constant 5.120000e+02 : f32
    %10 = vector.broadcast %cst_5 : f32 to vector<1x4x1xf32>
    %11 = arith.divf %4, %10 : vector<1x4x1xf32>
    %cst_6 = arith.constant 5.120000e+02 : f32
    %12 = vector.broadcast %cst_6 : f32 to vector<1x4x1xf32>
    %13 = arith.divf %9, %12 : vector<1x4x1xf32>
    %14 = arith.mulf %11, %11 : vector<1x4x1xf32>
    %15 = arith.subf %13, %14 : vector<1x4x1xf32>
    %cst_7 = arith.constant 0.000000e+00 : f32
    %16 = vector.broadcast %cst_7 : f32 to vector<1x4x1xf32>
    %17 = arith.maximumf %15, %16 : vector<1x4x1xf32>
    %cst_8 = arith.constant 9.99999974E-6 : f32
    %18 = vector.broadcast %cst_8 : f32 to vector<1x4x1xf32>
    %19 = arith.addf %17, %18 : vector<1x4x1xf32>
    %20 = math.rsqrt %19 : vector<1x4x1xf32>
    %c0_9 = arith.constant 0 : index
    %c0_10 = arith.constant 0 : index
    %21 = vector.load %arg2[%c0_9, %c0_10] : memref<4x1xf32, #tpu.memory_space<vmem>>, vector<4x1xf32>
    %22 = vector.shape_cast %21 : vector<4x1xf32> to vector<1x4x1xf32>
    %c0_11 = arith.constant 0 : index
    %c0_12 = arith.constant 0 : index
    %23 = vector.load %arg3[%c0_11, %c0_12] : memref<4x1xf32, #tpu.memory_space<vmem>>, vector<4x1xf32>
    %24 = vector.shape_cast %23 : vector<4x1xf32> to vector<1x4x1xf32>
    %25 = arith.mulf %22, %20 : vector<1x4x1xf32>
    %26 = arith.mulf %11, %25 : vector<1x4x1xf32>
    %27 = arith.subf %24, %26 : vector<1x4x1xf32>
    %c0_13 = arith.constant 0 : index
    %c0_14 = arith.constant 0 : index
    %c0_15 = arith.constant 0 : index
    %28 = vector.load %arg1[%c0_13, %c0_14, %c0_15] : memref<2x4x256xf32, #tpu.memory_space<vmem>>, vector<2x4x256xf32>
    %29 = vector.broadcast %25 : vector<1x4x1xf32> to vector<2x4x256xf32>
    %30 = arith.mulf %28, %29 : vector<2x4x256xf32>
    %31 = vector.broadcast %27 : vector<1x4x1xf32> to vector<2x4x256xf32>
    %32 = arith.addf %30, %31 : vector<2x4x256xf32>
    %c0_16 = arith.constant 0 : index
    %c0_17 = arith.constant 0 : index
    %c0_18 = arith.constant 0 : index
    %33 = vector.load %arg4[%c0_16, %c0_17, %c0_18] : memref<2x4x256xf32, #tpu.memory_space<vmem>>, vector<2x4x256xf32>
    tpu.vector_store %arg4[%c0_16, %c0_17, %c0_18], %32 {strides = array<i32>} : memref<2x4x256xf32, #tpu.memory_space<vmem>>, vector<2x4x256xf32>,
    return
  }
  func.func @transform_0(%arg0: i32) -> (i32, i32, i32) {
    %c0_i32 = arith.constant 0 : i32
    %c0_i32_0 = arith.constant 0 : i32
    %c0_i32_1 = arith.constant 0 : i32
    return %c0_i32, %arg0, %c0_i32_0 : i32, i32, i32
  }
  func.func @transform_1(%arg0: i32) -> (i32, i32) {
    %c0_i32 = arith.constant 0 : i32
    %c0_i32_0 = arith.constant 0 : i32
    return %arg0, %c0_i32 : i32, i32
  }
  func.func @transform_2(%arg0: i32) -> (i32, i32) {
    %c0_i32 = arith.constant 0 : i32
    %c0_i32_0 = arith.constant 0 : i32
    return %arg0, %c0_i32 : i32, i32
  }
  func.func @transform_3(%arg0: i32) -> (i32, i32, i32) {
    %c0_i32 = arith.constant 0 : i32
    %c0_i32_0 = arith.constant 0 : i32
    %c0_i32_1 = arith.constant 0 : i32
    return %c0_i32, %arg0, %c0_i32_0 : i32, i32, i32
  }
}

</mosaic_0001>

<bundles_post_ra>
// kernel: tpu_custom_call.1
= control target key start
LH: loop header
LB: loop body
LE: loop exit
PB: predicated region body
PF: predicated region fallthrough
CT: control target
= control target key end

     0   :  { %8 = vsyncpa [#allocation3], 0  ;;  %s282_s0 = inlined_call_operand.hbm [shape: f32[2,4,256], index: 0, kind: input, shape index: {}]   ;;  %s283_s1 = inlined_call_operand.vmem [shape: f32[4,1], index: 1, kind: input, shape index: {}]   ;;  %s284_s2 = inlined_call_operand.vmem [shape: f32[4,1], index: 2, kind: input, shape index: {}]   ;;  %s285_s3 = inlined_call_operand.hbm [shape: f32[2,4,256], index: 3, kind: output, shape index: {}]  }
   0x1   :  { %9 = vsyncpa [#allocation4], 0  ;;  %s192_s12 = smov [#allocation2]   ;;  %s144_s16 = scalar_lea.hbm %s282_s0, 256 }
   0x2   :  { %s15_s13 = sshll.u32 %s192_s12, 4  ;;  %p145_p0 = scmp.ne.s32.totalorder %s282_s0, %s144_s16  ;;  %s16_s13 = int_to_ptr.vmem [resolvable:$true] %s15_s13 }
   0x3   :  { %p148_p1 = scmp.lt.u32.totalorder %s144_s16, %s282_s0 }
   0x5   :  { %p150_p2 = pnand %p148_p1, %p145_p0 }
   0x7   :  { %153 = shalt.err (!%p150_p2)
}
   0x8   :  { %s154_s21 = scalar_lea.vmem %s16_s13, 256  ;;  %p159_p4 = scmp.lt.s32.totalorder %s16_s13, %s16_s13 }
   0x9   :  { %p155_p3 = scmp.ne.s32.totalorder %s16_s13, %s154_s21  ;;  %p160_p5 = scmp.lt.s32.totalorder %s154_s21, %s154_s21 }
   0xb   :  { %p161_p6 = por %p160_p5, %p159_p4 }
   0xd   :  { %p162_p7 = pnand %p161_p6, %p155_p3 }
   0xf   :  { %165 = shalt.err (!%p162_p7)
}
  0x10   :  { %s193_s22 = smov 128   ;;  %s194_s23 = smov 8  }
  0x11   :  { %21 = dma.hbm_to_vmem [thread:$0]  %s282_s0, 256, %s16_s13, [#allocation3], %s193_s22, %s193_s22, %s194_s23  }
  0x12   :  { %188 = dma.done.wait [#allocation3], 256  }
  0x13   :  { %189 = vsyncadd [#allocation3], 4294967040  ;;  %vm37_vm0 = vcmask 1043456   ;;  %v233_v0 = vld [vmem:[#allocation2] sm:$0xff]  ;;  %v235_v1 = vld [vmem:[#allocation2 + $0x8] sm:$0xff]  ;;  %v195_v20 = vmov 0   ;;  %v92_v45 = vlaneseq }
  0x14   :  { %v33_v2 = vcombine.high %v233_v0, %v233_v0  ;;  %v38_v3 = vsel %vm37_vm0, %v233_v0, 0.0  ;;  %v51_v4 = vmul.f32 %v233_v0, %v233_v0  ;;  %v34_v5 = vcombine.high %v235_v1, %v235_v1  ;;  %138 = vset.pattern.permute.xlu0 %v195_v20  ;;  %139 = vset.pattern.permute.xlu1 %v195_v20  ;;  %v80_v37 = vld [vmem:[%s283_s1] sm:$0xf]  ;;  %s197_s1 = smov [#allocation5]  }
  0x15   :  { %v43_v6 = vsel %vm37_vm0, %v235_v1, 0.0  ;;  %v52_v7 = vmul.f32 %v235_v1, %v235_v1  ;;  %v81_v40 = vld [vmem:[%s284_s2] sm:$0xf]  ;;  %v196_v43 = vmov 839922192   ;;  %v93_v47 = vshrl.u32 %v92_v45, 7 }
  0x16   :  { %v39_v8 = vsel %vm37_vm0, %v33_v2, 0.0  ;;  %v55_v9 = vcombine.high %v51_v4, %v51_v4  ;;  %v59_v10 = vsel %vm37_vm0, %v51_v4, 0.0  ;;  %v44_v11 = vsel %vm37_vm0, %v34_v5, 0.0  ;;  %s120_s29 = sshll.u32 %s197_s1, 4  ;;  %s121_s29 = int_to_ptr.vmem [resolvable:$true] %s120_s29 }
  0x17   :  { %v40_v12 = vadd.f32 %v39_v8, %v38_v3  ;;  %v56_v13 = vcombine.high %v52_v7, %v52_v7  ;;  %v64_v15 = vsel %vm37_vm0, %v52_v7, 0.0  ;;  %v45_v17 = vadd.f32 %v44_v11, %v43_v6  ;;  %s166_s2 = scalar_lea.vmem %s121_s29, 256  ;;  %p171_p9 = scmp.lt.s32.totalorder %s121_s29, %s121_s29 }
  0x18   :  { %v60_v14 = vsel %vm37_vm0, %v55_v9, 0.0  ;;  %v90_v44 = vunpack.c.l.s4 %v196_v43  ;;  %p167_p8 = scmp.ne.s32.totalorder %s121_s29, %s166_s2  ;;  %p172_p10 = scmp.lt.s32.totalorder %s166_s2, %s166_s2 }
  0x19   :  { %41 = vadd.xlane.f32.xlu0 %v40_v12  ;;  %v61_v16 = vadd.f32 %v60_v14, %v59_v10  ;;  %v65_v18 = vsel %vm37_vm0, %v56_v13, 0.0 }
  0x1a   :  { %v66_v19 = vadd.f32 %v65_v18, %v64_v15  ;;  %v91_v46 = vunpack.c.0.s8 %v90_v44  ;;  %p173_p11 = por %p172_p10, %p171_p9 }
  0x1b   :  { %62 = vadd.xlane.f32.xlu1 %v61_v16 }
  0x1c   :  { %v94_v48 = vsub.s32 %v91_v46, %v93_v47  ;;  %p174_p12 = pnand %p173_p11, %p167_p8 }
  0x1d   :  { %46 = vadd.xlane.f32.xlu0 %v45_v17 }
  0x1f   :  { %67 = vadd.xlane.f32.xlu1 %v66_v19 }
  0xa6   :  { %v42_v21 = vpop.xlane.xlu0 %41 }
  0xa7   :  { %v48_v24 = vsel %vm37_vm0, %v42_v21, 0.0 }
  0xa8   :  { %v63_v22 = vpop.xlane.xlu1 %62 }
  0xa9   :  { %v69_v28 = vsel %vm37_vm0, %v63_v22, 0.0 }
  0xaa   :  { %v47_v23 = vpop.xlane.xlu0 %46 }
  0xab   :  { %v49_v25 = vsel %vm37_vm0, %v47_v23, 0.0 }
  0xac   :  { %v50_v26 = vadd.f32 %v49_v25, %v48_v24  ;;  %v68_v27 = vpop.xlane.xlu1 %67 }
  0xad   :  { %v70_v29 = vsel %vm37_vm0, %v68_v27, 0.0 }
  0xae   :  { %v73_v30 = vmul.f32 0.001953125, %v50_v26  ;;  %v71_v31 = vadd.f32 %v70_v29, %v69_v28 }
  0xb0   :  { %v75_v32 = vmul.f32 %v73_v30, %v73_v30  ;;  %v74_v33 = vmul.f32 0.001953125, %v71_v31 }
  0xb2   :  { %v76_v34 = vsub.f32 %v74_v33, %v75_v32 }
  0xb4   :  { %v77_v35 = vmax.f32 %v76_v34, 0.0 }
  0xb6   :  { %v78_v36 = vadd.f32 1e-05, %v77_v35 }
  0xb8   :  { %142 = vrsqrt.f32 %v78_v36 }
  0xc2   :  { %v143_v38 = vpop.eup %142 }
  0xc3   :  { %v82_v39 = vmul.f32 %v143_v38, %v80_v37 }
  0xc5   :  { %87 = vperm.xlu0 %138, %v82_v39   ;;  %v83_v41 = vmul.f32 %v82_v39, %v73_v30 }
  0xc7   :  { %v84_v42 = vsub.f32 %v81_v40, %v83_v41 }
  0xc9   :  { %101 = vperm.xlu1 %139, %v84_v42  }
 0x144   :  { %v88_v49 = vpop.permute.xlu0 %87 }
 0x145   :  { %v95_v50 = vrot.slane %v88_v49, %v94_v48 }
 0x147   :  { %v97_v52 = vmul.f32 %v95_v50, %v233_v0  ;;  %v98_v53 = vmul.f32 %v95_v50, %v235_v1 }
 0x148   :  { %v102_v51 = vpop.permute.xlu1 %101 }
 0x149   :  { %v109_v54 = vrot.slane %v102_v51, %v94_v48 }
 0x14b   :  { %v111_v55 = vadd.f32 %v109_v54, %v97_v52  ;;  %v112_v56 = vadd.f32 %v109_v54, %v98_v53 }
 0x14d   :  { %113 = vst [vmem:[#allocation5] sm:$0xff] %v111_v55  ;;  %114 = vst [vmem:[#allocation5 + $0x8] sm:$0xff] %v112_v56 }
 0x14e   :  { %177 = shalt.err (!%p174_p12)
}
 0x14f   :  { %s178_s5 = scalar_lea.hbm %s285_s3, 256 }
 0x150   :  { %p179_p13 = scmp.ne.s32.totalorder %s285_s3, %s178_s5  ;;  %p182_p0 = scmp.lt.u32.totalorder %s178_s5, %s285_s3 }
 0x152   :  { %p184_p1 = pnand %p182_p0, %p179_p13 }
 0x154   :  { %187 = shalt.err (!%p184_p1)
}
 0x155   :  { %126 = dma.vmem_to_hbm [thread:$0]  %s121_s29, 256, %s285_s3, [#allocation4], %s193_s22, %s193_s22, %s194_s23  }
 0x156   :  { %190 = dma.done.wait [#allocation4], 256  }
 0x157   :  { %191 = vsyncadd [#allocation4], 4294967040 }
 0x158   :  { %130 = vsyncpa [#allocation3], 1 }
 0x159   :  { %131 = vsyncpa [#allocation4], 1 }

</bundles_post_ra>
